<compile_context>
chip_gen: v7x
topology: tpu7x:2x2x1
jax: 0.10.0
libtpu: 0.0.40
codegen_flags: <defaults>
</compile_context>

<pallas_src>
import jax
import jax.numpy as jnp
from jax.experimental import pallas as pl
from jax.experimental.pallas import tpu as pltpu  # noqa: F401  (kept for memory-space APIs)


def _elu(v):
    # ELU(alpha=1): x if x > 0 else exp(x) - 1 (guard exp on the dead branch)
    return jnp.where(v > 0, v, jnp.exp(jnp.minimum(v, 0.0)) - 1.0)


def _make_kernel(T, B, F):
    """Builds the single-invocation kernel (T, B, F are static)."""

    def kernel(x_ref, wc_ref, lstm_ref, hc_ref, out_ref):
        # ---- all-lag conv_3d: 1x1x1 Conv3d == block-diagonal channel matmul;
        #      bias arrives through the one-hot indicator columns of x_ref, so
        #      the whole thing (incl. bias) is ONE matmul; AvgPool(1,1,1) is id.
        conv_all = _elu(jnp.dot(x_ref[...], wc_ref[...],
                                preferred_element_type=jnp.float32))      # [T*B, F]

        # Packed LSTM parameters (torch gate order i,f,g,o along the 4F axis).
        wih = lstm_ref[0:F, :]                                            # [F, 4F]
        whh = lstm_ref[F:2 * F, :]                                        # [F, 4F]
        bl = lstm_ref[2 * F:2 * F + 1, :]                                 # [1, 4F]

        # ---- hoisted input-side gate projection for all lags (kept as a VALUE,
        #      ~2 f32 vregs; no VMEM scratch round-trip).
        z = jnp.dot(conv_all, wih, preferred_element_type=jnp.float32) + bl  # [T*B, 4F]

        h = hc_ref[0:B, :]                                                # [B, F]
        c = hc_ref[B:2 * B, :]                                            # [B, F]

        # ---- sequential LSTM recurrence, fully unrolled (T small & static).
        #      Only h_prev @ W_hh + elementwise gates are on the serial chain;
        #      gates stay register-resident and are sliced statically.
        outs = []
        for t in range(T):
            g = z[t * B:(t + 1) * B, :] + jnp.dot(
                h, whh, preferred_element_type=jnp.float32)               # [B, 4F]
            i_g = jax.nn.sigmoid(g[:, 0 * F:1 * F])
            f_g = jax.nn.sigmoid(g[:, 1 * F:2 * F])
            g_g = jnp.tanh(g[:, 2 * F:3 * F])
            o_g = jax.nn.sigmoid(g[:, 3 * F:4 * F])
            c = f_g * c + i_g * g_g
            h = o_g * jnp.tanh(c)
            outs.append(_elu(h))                                          # final act_func fused

        # Single lane-dense store: (B, T*F) slab, column block t = lag t output.
        out_ref[...] = jnp.concatenate(outs, axis=-1)

    return kernel


def time_distr_conv_3d_forward(x, params, h0, c0):
    """x: [B, T, H, W, C] with H == W == 1.  Returns [B, T, 1, 1, F]."""
    B, T, H, W, C = x.shape
    assert H == 1 and W == 1, "only the H=W=1 configuration of the module is runnable"
    wc, bc, wih, whh, bl = params
    F = wc.shape[-1]
    # Guard: block-diag fusion only while the contraction fits one MXU pass.
    assert T * (C + 1) <= 128, "block-diagonal conv fusion only used for small T*C"

    # ---- wrapper-side layout plumbing (tiny arrays, pure XLA):
    x_tbc = jnp.transpose(x.reshape(B, T, C), (1, 0, 2)).astype(jnp.float32)   # [T,B,C]
    eye_t = jnp.eye(T, dtype=jnp.float32)
    # Block-diagonal slab: x_bd[t*B+b, t*C:(t+1)*C] = x[t, b, :]
    x_bd = jnp.einsum('tbc,ts->tbsc', x_tbc, eye_t).reshape(T * B, T * C)
    # One-hot lag indicator columns fold the per-lag conv bias into the matmul.
    ind = jnp.repeat(eye_t, B, axis=0)                                         # [T*B, T]
    x_aug = jnp.concatenate([x_bd, ind], axis=1)                               # [T*B, T*(C+1)]
    wc_aug = jnp.concatenate([wc.reshape(T * C, F), bc], axis=0)               # [T*(C+1), F]

    # Pack LSTM params into one slab, and h0/c0 into one slab (fewer input DMAs).
    lstm_slab = jnp.concatenate([wih, whh, bl], axis=0)                        # [2F+1, 4F]
    hc0 = jnp.concatenate([h0, c0], axis=0)                                    # [2B, F]

    out = pl.pallas_call(
        _make_kernel(T, B, F),
        out_shape=jax.ShapeDtypeStruct((B, T * F), jnp.float32),
    )(x_aug, wc_aug, lstm_slab, hc0)

    # rearrange 'b (t w h c) -> b t w h c' with w = h = 1
    return out.reshape(B, T, 1, 1, F)


def init_params(key, T, C, F):
    """Deterministic synthetic parameters (fused-gate layout, shapes match torch)."""
    ks = jax.random.split(key, 6)
    cb = 1.0 / (C ** 0.5)                         # Conv3d fan_in = C * 1 * 1 * 1
    wc = jax.random.uniform(ks[0], (T, C, F), jnp.float32, -cb, cb)    # per-lag [F,C,1,1,1]^T
    bc = jax.random.uniform(ks[1], (T, F), jnp.float32, -cb, cb)
    lb = 1.0 / (F ** 0.5)                         # LSTM hidden_size = F
    wih = jax.random.uniform(ks[2], (F, 4 * F), jnp.float32, -lb, lb)  # [i|f|g|o] concat
    whh = jax.random.uniform(ks[3], (F, 4 * F), jnp.float32, -lb, lb)
    b_ih = jax.random.uniform(ks[4], (1, 4 * F), jnp.float32, -lb, lb)
    b_hh = jax.random.uniform(ks[5], (1, 4 * F), jnp.float32, -lb, lb)
    return wc, bc, wih, whh, b_ih + b_hh


def reference_forward(x, params, h0, c0):
    """Pure-JAX reference mirroring the torch forward (for correctness check)."""
    B, T, H, W, C = x.shape
    wc, bc, wih, whh, bl = params
    F = wc.shape[-1]
    xt = jnp.transpose(x.reshape(B, T, C), (1, 0, 2)).astype(jnp.float32)      # [T, B, C]
    conv = _elu(jnp.einsum('tbc,tcf->tbf', xt, wc) + bc[:, None, :])           # [T, B, F]

    def step(carry, z):
        h, c = carry
        gates = z @ wih + h @ whh + bl                                         # [B, 4F]
        i = jax.nn.sigmoid(gates[:, :F])
        f = jax.nn.sigmoid(gates[:, F:2 * F])
        g = jnp.tanh(gates[:, 2 * F:3 * F])
        o = jax.nn.sigmoid(gates[:, 3 * F:])
        c = f * c + i * g
        h = o * jnp.tanh(c)
        return (h, c), h

    (_, _), hs = jax.lax.scan(step, (h0, c0), conv)                            # [T, B, F]
    out = _elu(hs)
    return jnp.transpose(out, (1, 0, 2)).reshape(B, T, 1, 1, F)


if __name__ == "__main__":
    # Module hyperparameters: params = {'filters': 32, 'act_func': 'elu', 'batch_norm': False},
    # size = 2, name_scope = 'data', layer_id = 0  ->  F = filters * (layer_id + 1) = 32.
    B, T, H, W, C, F = 2, 8, 1, 1, 4, 32

    key = jax.random.PRNGKey(0)
    kx, kh, kc, kp = jax.random.split(key, 4)

    x = jax.random.uniform(kx, (B, T, H, W, C), jnp.float32)
    params = init_params(kp, T, C, F)
    # torch forward draws a fresh uniform hidden state each call: torch.rand(1, B, F)
    h0 = jax.random.uniform(kh, (B, F), jnp.float32)
    c0 = jax.random.uniform(kc, (B, F), jnp.float32)

    out = jax.block_until_ready(time_distr_conv_3d_forward(x, params, h0, c0))
    ref = jax.block_until_ready(reference_forward(x, params, h0, c0))

    assert out.shape == (B, T, 1, 1, F), out.shape
    err = float(jnp.max(jnp.abs(out - ref)))
    assert jnp.allclose(out, ref, rtol=1e-4, atol=1e-4), err
    print("KERNEL_OK")
</pallas_src>

<mosaic_0001>
module attributes {stable_mosaic.version = 11 : i64} {
  func.func @kernel(%arg0: memref<16x40xf32, #tpu.memory_space<vmem>>, %arg1: memref<40x32xf32, #tpu.memory_space<vmem>>, %arg2: memref<65x128xf32, #tpu.memory_space<vmem>>, %arg3: memref<4x32xf32, #tpu.memory_space<vmem>>, %arg4: memref<2x256xf32, #tpu.memory_space<vmem>>) attributes {dimension_semantics = [], scalar_prefetch = 0 : i64, scratch_operands = 0 : i64, tpu.core_type = #tpu.core_type<tc>} {
    %c0 = arith.constant 0 : index
    %c0_0 = arith.constant 0 : index
    %0 = vector.load %arg0[%c0, %c0_0] : memref<16x40xf32, #tpu.memory_space<vmem>>, vector<16x40xf32>
    %c0_1 = arith.constant 0 : index
    %c0_2 = arith.constant 0 : index
    %1 = vector.load %arg1[%c0_1, %c0_2] : memref<40x32xf32, #tpu.memory_space<vmem>>, vector<40x32xf32>
    %cst = arith.constant dense<0.000000e+00> : vector<16x32xf32>
    %2 = tpu.matmul %0, %1, %cst {dimension_numbers = #tpu.dot_dimension_numbers<[1], [0], [0], [1], [0, 0, 1, 1], [], []>} : vector<16x40xf32>, vector<40x32xf32>, vector<16x32xf32> -> vector<16x32xf32>
    %cst_3 = arith.constant 0.000000e+00 : f32
    %3 = vector.broadcast %cst_3 : f32 to vector<16x32xf32>
    %4 = arith.cmpf ogt, %2, %3 : vector<16x32xf32>
    %cst_4 = arith.constant 0.000000e+00 : f32
    %5 = vector.broadcast %cst_4 : f32 to vector<16x32xf32>
    %6 = arith.minimumf %2, %5 : vector<16x32xf32>
    %7 = math.exp %6 : vector<16x32xf32>
    %cst_5 = arith.constant 1.000000e+00 : f32
    %8 = vector.broadcast %cst_5 : f32 to vector<16x32xf32>
    %9 = arith.subf %7, %8 : vector<16x32xf32>
    %10 = arith.select %4, %2, %9 : vector<16x32xi1>, vector<16x32xf32>
    %c0_6 = arith.constant 0 : index
    %c0_7 = arith.constant 0 : index
    %11 = vector.load %arg2[%c0_6, %c0_7] : memref<65x128xf32, #tpu.memory_space<vmem>>, vector<32x128xf32>
    %c32 = arith.constant 32 : index
    %c0_8 = arith.constant 0 : index
    %12 = vector.load %arg2[%c32, %c0_8] : memref<65x128xf32, #tpu.memory_space<vmem>>, vector<32x128xf32>
    %c64 = arith.constant 64 : index
    %c0_9 = arith.constant 0 : index
    %13 = vector.load %arg2[%c64, %c0_9] : memref<65x128xf32, #tpu.memory_space<vmem>>, vector<1x128xf32>
    %cst_10 = arith.constant dense<0.000000e+00> : vector<16x128xf32>
    %14 = tpu.matmul %10, %11, %cst_10 {dimension_numbers = #tpu.dot_dimension_numbers<[1], [0], [0], [1], [0, 0, 1, 1], [], []>} : vector<16x32xf32>, vector<32x128xf32>, vector<16x128xf32> -> vector<16x128xf32>
    %15 = vector.broadcast %13 : vector<1x128xf32> to vector<16x128xf32>
    %16 = arith.addf %14, %15 : vector<16x128xf32>
    %c0_11 = arith.constant 0 : index
    %c0_12 = arith.constant 0 : index
    %17 = vector.load %arg3[%c0_11, %c0_12] : memref<4x32xf32, #tpu.memory_space<vmem>>, vector<2x32xf32>
    %c2 = arith.constant 2 : index
    %c0_13 = arith.constant 0 : index
    %18 = vector.load %arg3[%c2, %c0_13] : memref<4x32xf32, #tpu.memory_space<vmem>>, vector<2x32xf32>
    %19 = vector.extract_strided_slice %16 {offsets = [0, 0], sizes = [2, 128], strides = [1, 1]} : vector<16x128xf32> to vector<2x128xf32>
    %cst_14 = arith.constant dense<0.000000e+00> : vector<2x128xf32>
    %20 = tpu.matmul %17, %12, %cst_14 {dimension_numbers = #tpu.dot_dimension_numbers<[1], [0], [0], [1], [0, 0, 1, 1], [], []>} : vector<2x32xf32>, vector<32x128xf32>, vector<2x128xf32> -> vector<2x128xf32>
    %21 = arith.addf %19, %20 : vector<2x128xf32>
    %22 = vector.extract_strided_slice %21 {offsets = [0, 0], sizes = [2, 32], strides = [1, 1]} : vector<2x128xf32> to vector<2x32xf32>
    %23 = arith.negf %22 : vector<2x32xf32>
    %24 = math.exp %23 : vector<2x32xf32>
    %cst_15 = arith.constant 1.000000e+00 : f32
    %25 = vector.broadcast %cst_15 : f32 to vector<2x32xf32>
    %26 = arith.addf %25, %24 : vector<2x32xf32>
    %27 = arith.divf %25, %26 : vector<2x32xf32>
    %28 = vector.extract_strided_slice %21 {offsets = [0, 32], sizes = [2, 32], strides = [1, 1]} : vector<2x128xf32> to vector<2x32xf32>
    %29 = arith.negf %28 : vector<2x32xf32>
    %30 = math.exp %29 : vector<2x32xf32>
    %cst_16 = arith.constant 1.000000e+00 : f32
    %31 = vector.broadcast %cst_16 : f32 to vector<2x32xf32>
    %32 = arith.addf %31, %30 : vector<2x32xf32>
    %33 = arith.divf %31, %32 : vector<2x32xf32>
    %34 = vector.extract_strided_slice %21 {offsets = [0, 64], sizes = [2, 32], strides = [1, 1]} : vector<2x128xf32> to vector<2x32xf32>
    %35 = math.tanh %34 : vector<2x32xf32>
    %36 = vector.extract_strided_slice %21 {offsets = [0, 96], sizes = [2, 32], strides = [1, 1]} : vector<2x128xf32> to vector<2x32xf32>
    %37 = arith.negf %36 : vector<2x32xf32>
    %38 = math.exp %37 : vector<2x32xf32>
    %cst_17 = arith.constant 1.000000e+00 : f32
    %39 = vector.broadcast %cst_17 : f32 to vector<2x32xf32>
    %40 = arith.addf %39, %38 : vector<2x32xf32>
    %41 = arith.divf %39, %40 : vector<2x32xf32>
    %42 = arith.mulf %33, %18 : vector<2x32xf32>
    %43 = arith.mulf %27, %35 : vector<2x32xf32>
    %44 = arith.addf %42, %43 : vector<2x32xf32>
    %45 = math.tanh %44 : vector<2x32xf32>
    %46 = arith.mulf %41, %45 : vector<2x32xf32>
    %cst_18 = arith.constant 0.000000e+00 : f32
    %47 = vector.broadcast %cst_18 : f32 to vector<2x32xf32>
    %48 = arith.cmpf ogt, %46, %47 : vector<2x32xf32>
    %cst_19 = arith.constant 0.000000e+00 : f32
    %49 = vector.broadcast %cst_19 : f32 to vector<2x32xf32>
    %50 = arith.minimumf %46, %49 : vector<2x32xf32>
    %51 = math.exp %50 : vector<2x32xf32>
    %cst_20 = arith.constant 1.000000e+00 : f32
    %52 = vector.broadcast %cst_20 : f32 to vector<2x32xf32>
    %53 = arith.subf %51, %52 : vector<2x32xf32>
    %54 = arith.select %48, %46, %53 : vector<2x32xi1>, vector<2x32xf32>
    %55 = vector.extract_strided_slice %16 {offsets = [2, 0], sizes = [2, 128], strides = [1, 1]} : vector<16x128xf32> to vector<2x128xf32>
    %cst_21 = arith.constant dense<0.000000e+00> : vector<2x128xf32>
    %56 = tpu.matmul %46, %12, %cst_21 {dimension_numbers = #tpu.dot_dimension_numbers<[1], [0], [0], [1], [0, 0, 1, 1], [], []>} : vector<2x32xf32>, vector<32x128xf32>, vector<2x128xf32> -> vector<2x128xf32>
    %57 = arith.addf %55, %56 : vector<2x128xf32>
    %58 = vector.extract_strided_slice %57 {offsets = [0, 0], sizes = [2, 32], strides = [1, 1]} : vector<2x128xf32> to vector<2x32xf32>
    %59 = arith.negf %58 : vector<2x32xf32>
    %60 = math.exp %59 : vector<2x32xf32>
    %cst_22 = arith.constant 1.000000e+00 : f32
    %61 = vector.broadcast %cst_22 : f32 to vector<2x32xf32>
    %62 = arith.addf %61, %60 : vector<2x32xf32>
    %63 = arith.divf %61, %62 : vector<2x32xf32>
    %64 = vector.extract_strided_slice %57 {offsets = [0, 32], sizes = [2, 32], strides = [1, 1]} : vector<2x128xf32> to vector<2x32xf32>
    %65 = arith.negf %64 : vector<2x32xf32>
    %66 = math.exp %65 : vector<2x32xf32>
    %cst_23 = arith.constant 1.000000e+00 : f32
    %67 = vector.broadcast %cst_23 : f32 to vector<2x32xf32>
    %68 = arith.addf %67, %66 : vector<2x32xf32>
    %69 = arith.divf %67, %68 : vector<2x32xf32>
    %70 = vector.extract_strided_slice %57 {offsets = [0, 64], sizes = [2, 32], strides = [1, 1]} : vector<2x128xf32> to vector<2x32xf32>
    %71 = math.tanh %70 : vector<2x32xf32>
    %72 = vector.extract_strided_slice %57 {offsets = [0, 96], sizes = [2, 32], strides = [1, 1]} : vector<2x128xf32> to vector<2x32xf32>
    %73 = arith.negf %72 : vector<2x32xf32>
    %74 = math.exp %73 : vector<2x32xf32>
    %cst_24 = arith.constant 1.000000e+00 : f32
    %75 = vector.broadcast %cst_24 : f32 to vector<2x32xf32>
    %76 = arith.addf %75, %74 : vector<2x32xf32>
    %77 = arith.divf %75, %76 : vector<2x32xf32>
    %78 = arith.mulf %69, %44 : vector<2x32xf32>
    %79 = arith.mulf %63, %71 : vector<2x32xf32>
    %80 = arith.addf %78, %79 : vector<2x32xf32>
    %81 = math.tanh %80 : vector<2x32xf32>
    %82 = arith.mulf %77, %81 : vector<2x32xf32>
    %cst_25 = arith.constant 0.000000e+00 : f32
    %83 = vector.broadcast %cst_25 : f32 to vector<2x32xf32>
    %84 = arith.cmpf ogt, %82, %83 : vector<2x32xf32>
    %cst_26 = arith.constant 0.000000e+00 : f32
    %85 = vector.broadcast %cst_26 : f32 to vector<2x32xf32>
    %86 = arith.minimumf %82, %85 : vector<2x32xf32>
    %87 = math.exp %86 : vector<2x32xf32>
    %cst_27 = arith.constant 1.000000e+00 : f32
    %88 = vector.broadcast %cst_27 : f32 to vector<2x32xf32>
    %89 = arith.subf %87, %88 : vector<2x32xf32>
    %90 = arith.select %84, %82, %89 : vector<2x32xi1>, vector<2x32xf32>
    %91 = vector.extract_strided_slice %16 {offsets = [4, 0], sizes = [2, 128], strides = [1, 1]} : vector<16x128xf32> to vector<2x128xf32>
    %cst_28 = arith.constant dense<0.000000e+00> : vector<2x128xf32>
    %92 = tpu.matmul %82, %12, %cst_28 {dimension_numbers = #tpu.dot_dimension_numbers<[1], [0], [0], [1], [0, 0, 1, 1], [], []>} : vector<2x32xf32>, vector<32x128xf32>, vector<2x128xf32> -> vector<2x128xf32>
    %93 = arith.addf %91, %92 : vector<2x128xf32>
    %94 = vector.extract_strided_slice %93 {offsets = [0, 0], sizes = [2, 32], strides = [1, 1]} : vector<2x128xf32> to vector<2x32xf32>
    %95 = arith.negf %94 : vector<2x32xf32>
    %96 = math.exp %95 : vector<2x32xf32>
    %cst_29 = arith.constant 1.000000e+00 : f32
    %97 = vector.broadcast %cst_29 : f32 to vector<2x32xf32>
    %98 = arith.addf %97, %96 : vector<2x32xf32>
    %99 = arith.divf %97, %98 : vector<2x32xf32>
    %100 = vector.extract_strided_slice %93 {offsets = [0, 32], sizes = [2, 32], strides = [1, 1]} : vector<2x128xf32> to vector<2x32xf32>
    %101 = arith.negf %100 : vector<2x32xf32>
    %102 = math.exp %101 : vector<2x32xf32>
    %cst_30 = arith.constant 1.000000e+00 : f32
    %103 = vector.broadcast %cst_30 : f32 to vector<2x32xf32>
    %104 = arith.addf %103, %102 : vector<2x32xf32>
    %105 = arith.divf %103, %104 : vector<2x32xf32>
    %106 = vector.extract_strided_slice %93 {offsets = [0, 64], sizes = [2, 32], strides = [1, 1]} : vector<2x128xf32> to vector<2x32xf32>
    %107 = math.tanh %106 : vector<2x32xf32>
    %108 = vector.extract_strided_slice %93 {offsets = [0, 96], sizes = [2, 32], strides = [1, 1]} : vector<2x128xf32> to vector<2x32xf32>
    %109 = arith.negf %108 : vector<2x32xf32>
    %110 = math.exp %109 : vector<2x32xf32>
    %cst_31 = arith.constant 1.000000e+00 : f32
    %111 = vector.broadcast %cst_31 : f32 to vector<2x32xf32>
    %112 = arith.addf %111, %110 : vector<2x32xf32>
    %113 = arith.divf %111, %112 : vector<2x32xf32>
    %114 = arith.mulf %105, %80 : vector<2x32xf32>
    %115 = arith.mulf %99, %107 : vector<2x32xf32>
    %116 = arith.addf %114, %115 : vector<2x32xf32>
    %117 = math.tanh %116 : vector<2x32xf32>
    %118 = arith.mulf %113, %117 : vector<2x32xf32>
    %cst_32 = arith.constant 0.000000e+00 : f32
    %119 = vector.broadcast %cst_32 : f32 to vector<2x32xf32>
    %120 = arith.cmpf ogt, %118, %119 : vector<2x32xf32>
    %cst_33 = arith.constant 0.000000e+00 : f32
    %121 = vector.broadcast %cst_33 : f32 to vector<2x32xf32>
    %122 = arith.minimumf %118, %121 : vector<2x32xf32>
    %123 = math.exp %122 : vector<2x32xf32>
    %cst_34 = arith.constant 1.000000e+00 : f32
    %124 = vector.broadcast %cst_34 : f32 to vector<2x32xf32>
    %125 = arith.subf %123, %124 : vector<2x32xf32>
    %126 = arith.select %120, %118, %125 : vector<2x32xi1>, vector<2x32xf32>
    %127 = vector.extract_strided_slice %16 {offsets = [6, 0], sizes = [2, 128], strides = [1, 1]} : vector<16x128xf32> to vector<2x128xf32>
    %cst_35 = arith.constant dense<0.000000e+00> : vector<2x128xf32>
    %128 = tpu.matmul %118, %12, %cst_35 {dimension_numbers = #tpu.dot_dimension_numbers<[1], [0], [0], [1], [0, 0, 1, 1], [], []>} : vector<2x32xf32>, vector<32x128xf32>, vector<2x128xf32> -> vector<2x128xf32>
    %129 = arith.addf %127, %128 : vector<2x128xf32>
    %130 = vector.extract_strided_slice %129 {offsets = [0, 0], sizes = [2, 32], strides = [1, 1]} : vector<2x128xf32> to vector<2x32xf32>
    %131 = arith.negf %130 : vector<2x32xf32>
    %132 = math.exp %131 : vector<2x32xf32>
    %cst_36 = arith.constant 1.000000e+00 : f32
    %133 = vector.broadcast %cst_36 : f32 to vector<2x32xf32>
    %134 = arith.addf %133, %132 : vector<2x32xf32>
    %135 = arith.divf %133, %134 : vector<2x32xf32>
    %136 = vector.extract_strided_slice %129 {offsets = [0, 32], sizes = [2, 32], strides = [1, 1]} : vector<2x128xf32> to vector<2x32xf32>
    %137 = arith.negf %136 : vector<2x32xf32>
    %138 = math.exp %137 : vector<2x32xf32>
    %cst_37 = arith.constant 1.000000e+00 : f32
    %139 = vector.broadcast %cst_37 : f32 to vector<2x32xf32>
    %140 = arith.addf %139, %138 : vector<2x32xf32>
    %141 = arith.divf %139, %140 : vector<2x32xf32>
    %142 = vector.extract_strided_slice %129 {offsets = [0, 64], sizes = [2, 32], strides = [1, 1]} : vector<2x128xf32> to vector<2x32xf32>
    %143 = math.tanh %142 : vector<2x32xf32>
    %144 = vector.extract_strided_slice %129 {offsets = [0, 96], sizes = [2, 32], strides = [1, 1]} : vector<2x128xf32> to vector<2x32xf32>
    %145 = arith.negf %144 : vector<2x32xf32>
    %146 = math.exp %145 : vector<2x32xf32>
    %cst_38 = arith.constant 1.000000e+00 : f32
    %147 = vector.broadcast %cst_38 : f32 to vector<2x32xf32>
    %148 = arith.addf %147, %146 : vector<2x32xf32>
    %149 = arith.divf %147, %148 : vector<2x32xf32>
    %150 = arith.mulf %141, %116 : vector<2x32xf32>
    %151 = arith.mulf %135, %143 : vector<2x32xf32>
    %152 = arith.addf %150, %151 : vector<2x32xf32>
    %153 = math.tanh %152 : vector<2x32xf32>
    %154 = arith.mulf %149, %153 : vector<2x32xf32>
    %cst_39 = arith.constant 0.000000e+00 : f32
    %155 = vector.broadcast %cst_39 : f32 to vector<2x32xf32>
    %156 = arith.cmpf ogt, %154, %155 : vector<2x32xf32>
    %cst_40 = arith.constant 0.000000e+00 : f32
    %157 = vector.broadcast %cst_40 : f32 to vector<2x32xf32>
    %158 = arith.minimumf %154, %157 : vector<2x32xf32>
    %159 = math.exp %158 : vector<2x32xf32>
    %cst_41 = arith.constant 1.000000e+00 : f32
    %160 = vector.broadcast %cst_41 : f32 to vector<2x32xf32>
    %161 = arith.subf %159, %160 : vector<2x32xf32>
    %162 = arith.select %156, %154, %161 : vector<2x32xi1>, vector<2x32xf32>
    %163 = vector.extract_strided_slice %16 {offsets = [8, 0], sizes = [2, 128], strides = [1, 1]} : vector<16x128xf32> to vector<2x128xf32>
    %cst_42 = arith.constant dense<0.000000e+00> : vector<2x128xf32>
    %164 = tpu.matmul %154, %12, %cst_42 {dimension_numbers = #tpu.dot_dimension_numbers<[1], [0], [0], [1], [0, 0, 1, 1], [], []>} : vector<2x32xf32>, vector<32x128xf32>, vector<2x128xf32> -> vector<2x128xf32>
    %165 = arith.addf %163, %164 : vector<2x128xf32>
    %166 = vector.extract_strided_slice %165 {offsets = [0, 0], sizes = [2, 32], strides = [1, 1]} : vector<2x128xf32> to vector<2x32xf32>
    %167 = arith.negf %166 : vector<2x32xf32>
    %168 = math.exp %167 : vector<2x32xf32>
    %cst_43 = arith.constant 1.000000e+00 : f32
    %169 = vector.broadcast %cst_43 : f32 to vector<2x32xf32>
    %170 = arith.addf %169, %168 : vector<2x32xf32>
    %171 = arith.divf %169, %170 : vector<2x32xf32>
    %172 = vector.extract_strided_slice %165 {offsets = [0, 32], sizes = [2, 32], strides = [1, 1]} : vector<2x128xf32> to vector<2x32xf32>
    %173 = arith.negf %172 : vector<2x32xf32>
    %174 = math.exp %173 : vector<2x32xf32>
    %cst_44 = arith.constant 1.000000e+00 : f32
    %175 = vector.broadcast %cst_44 : f32 to vector<2x32xf32>
    %176 = arith.addf %175, %174 : vector<2x32xf32>
    %177 = arith.divf %175, %176 : vector<2x32xf32>
    %178 = vector.extract_strided_slice %165 {offsets = [0, 64], sizes = [2, 32], strides = [1, 1]} : vector<2x128xf32> to vector<2x32xf32>
    %179 = math.tanh %178 : vector<2x32xf32>
    %180 = vector.extract_strided_slice %165 {offsets = [0, 96], sizes = [2, 32], strides = [1, 1]} : vector<2x128xf32> to vector<2x32xf32>
    %181 = arith.negf %180 : vector<2x32xf32>
    %182 = math.exp %181 : vector<2x32xf32>
    %cst_45 = arith.constant 1.000000e+00 : f32
    %183 = vector.broadcast %cst_45 : f32 to vector<2x32xf32>
    %184 = arith.addf %183, %182 : vector<2x32xf32>
    %185 = arith.divf %183, %184 : vector<2x32xf32>
    %186 = arith.mulf %177, %152 : vector<2x32xf32>
    %187 = arith.mulf %171, %179 : vector<2x32xf32>
    %188 = arith.addf %186, %187 : vector<2x32xf32>
    %189 = math.tanh %188 : vector<2x32xf32>
    %190 = arith.mulf %185, %189 : vector<2x32xf32>
    %cst_46 = arith.constant 0.000000e+00 : f32
    %191 = vector.broadcast %cst_46 : f32 to vector<2x32xf32>
    %192 = arith.cmpf ogt, %190, %191 : vector<2x32xf32>
    %cst_47 = arith.constant 0.000000e+00 : f32
    %193 = vector.broadcast %cst_47 : f32 to vector<2x32xf32>
    %194 = arith.minimumf %190, %193 : vector<2x32xf32>
    %195 = math.exp %194 : vector<2x32xf32>
    %cst_48 = arith.constant 1.000000e+00 : f32
    %196 = vector.broadcast %cst_48 : f32 to vector<2x32xf32>
    %197 = arith.subf %195, %196 : vector<2x32xf32>
    %198 = arith.select %192, %190, %197 : vector<2x32xi1>, vector<2x32xf32>
    %199 = vector.extract_strided_slice %16 {offsets = [10, 0], sizes = [2, 128], strides = [1, 1]} : vector<16x128xf32> to vector<2x128xf32>
    %cst_49 = arith.constant dense<0.000000e+00> : vector<2x128xf32>
    %200 = tpu.matmul %190, %12, %cst_49 {dimension_numbers = #tpu.dot_dimension_numbers<[1], [0], [0], [1], [0, 0, 1, 1], [], []>} : vector<2x32xf32>, vector<32x128xf32>, vector<2x128xf32> -> vector<2x128xf32>
    %201 = arith.addf %199, %200 : vector<2x128xf32>
    %202 = vector.extract_strided_slice %201 {offsets = [0, 0], sizes = [2, 32], strides = [1, 1]} : vector<2x128xf32> to vector<2x32xf32>
    %203 = arith.negf %202 : vector<2x32xf32>
    %204 = math.exp %203 : vector<2x32xf32>
    %cst_50 = arith.constant 1.000000e+00 : f32
    %205 = vector.broadcast %cst_50 : f32 to vector<2x32xf32>
    %206 = arith.addf %205, %204 : vector<2x32xf32>
    %207 = arith.divf %205, %206 : vector<2x32xf32>
    %208 = vector.extract_strided_slice %201 {offsets = [0, 32], sizes = [2, 32], strides = [1, 1]} : vector<2x128xf32> to vector<2x32xf32>
    %209 = arith.negf %208 : vector<2x32xf32>
    %210 = math.exp %209 : vector<2x32xf32>
    %cst_51 = arith.constant 1.000000e+00 : f32
    %211 = vector.broadcast %cst_51 : f32 to vector<2x32xf32>
    %212 = arith.addf %211, %210 : vector<2x32xf32>
    %213 = arith.divf %211, %212 : vector<2x32xf32>
    %214 = vector.extract_strided_slice %201 {offsets = [0, 64], sizes = [2, 32], strides = [1, 1]} : vector<2x128xf32> to vector<2x32xf32>
    %215 = math.tanh %214 : vector<2x32xf32>
    %216 = vector.extract_strided_slice %201 {offsets = [0, 96], sizes = [2, 32], strides = [1, 1]} : vector<2x128xf32> to vector<2x32xf32>
    %217 = arith.negf %216 : vector<2x32xf32>
    %218 = math.exp %217 : vector<2x32xf32>
    %cst_52 = arith.constant 1.000000e+00 : f32
    %219 = vector.broadcast %cst_52 : f32 to vector<2x32xf32>
    %220 = arith.addf %219, %218 : vector<2x32xf32>
    %221 = arith.divf %219, %220 : vector<2x32xf32>
    %222 = arith.mulf %213, %188 : vector<2x32xf32>
    %223 = arith.mulf %207, %215 : vector<2x32xf32>
    %224 = arith.addf %222, %223 : vector<2x32xf32>
    %225 = math.tanh %224 : vector<2x32xf32>
    %226 = arith.mulf %221, %225 : vector<2x32xf32>
    %cst_53 = arith.constant 0.000000e+00 : f32
    %227 = vector.broadcast %cst_53 : f32 to vector<2x32xf32>
    %228 = arith.cmpf ogt, %226, %227 : vector<2x32xf32>
    %cst_54 = arith.constant 0.000000e+00 : f32
    %229 = vector.broadcast %cst_54 : f32 to vector<2x32xf32>
    %230 = arith.minimumf %226, %229 : vector<2x32xf32>
    %231 = math.exp %230 : vector<2x32xf32>
    %cst_55 = arith.constant 1.000000e+00 : f32
    %232 = vector.broadcast %cst_55 : f32 to vector<2x32xf32>
    %233 = arith.subf %231, %232 : vector<2x32xf32>
    %234 = arith.select %228, %226, %233 : vector<2x32xi1>, vector<2x32xf32>
    %235 = vector.extract_strided_slice %16 {offsets = [12, 0], sizes = [2, 128], strides = [1, 1]} : vector<16x128xf32> to vector<2x128xf32>
    %cst_56 = arith.constant dense<0.000000e+00> : vector<2x128xf32>
    %236 = tpu.matmul %226, %12, %cst_56 {dimension_numbers = #tpu.dot_dimension_numbers<[1], [0], [0], [1], [0, 0, 1, 1], [], []>} : vector<2x32xf32>, vector<32x128xf32>, vector<2x128xf32> -> vector<2x128xf32>
    %237 = arith.addf %235, %236 : vector<2x128xf32>
    %238 = vector.extract_strided_slice %237 {offsets = [0, 0], sizes = [2, 32], strides = [1, 1]} : vector<2x128xf32> to vector<2x32xf32>
    %239 = arith.negf %238 : vector<2x32xf32>
    %240 = math.exp %239 : vector<2x32xf32>
    %cst_57 = arith.constant 1.000000e+00 : f32
    %241 = vector.broadcast %cst_57 : f32 to vector<2x32xf32>
    %242 = arith.addf %241, %240 : vector<2x32xf32>
    %243 = arith.divf %241, %242 : vector<2x32xf32>
    %244 = vector.extract_strided_slice %237 {offsets = [0, 32], sizes = [2, 32], strides = [1, 1]} : vector<2x128xf32> to vector<2x32xf32>
    %245 = arith.negf %244 : vector<2x32xf32>
    %246 = math.exp %245 : vector<2x32xf32>
    %cst_58 = arith.constant 1.000000e+00 : f32
    %247 = vector.broadcast %cst_58 : f32 to vector<2x32xf32>
    %248 = arith.addf %247, %246 : vector<2x32xf32>
    %249 = arith.divf %247, %248 : vector<2x32xf32>
    %250 = vector.extract_strided_slice %237 {offsets = [0, 64], sizes = [2, 32], strides = [1, 1]} : vector<2x128xf32> to vector<2x32xf32>
    %251 = math.tanh %250 : vector<2x32xf32>
    %252 = vector.extract_strided_slice %237 {offsets = [0, 96], sizes = [2, 32], strides = [1, 1]} : vector<2x128xf32> to vector<2x32xf32>
    %253 = arith.negf %252 : vector<2x32xf32>
    %254 = math.exp %253 : vector<2x32xf32>
    %cst_59 = arith.constant 1.000000e+00 : f32
    %255 = vector.broadcast %cst_59 : f32 to vector<2x32xf32>
    %256 = arith.addf %255, %254 : vector<2x32xf32>
    %257 = arith.divf %255, %256 : vector<2x32xf32>
    %258 = arith.mulf %249, %224 : vector<2x32xf32>
    %259 = arith.mulf %243, %251 : vector<2x32xf32>
    %260 = arith.addf %258, %259 : vector<2x32xf32>
    %261 = math.tanh %260 : vector<2x32xf32>
    %262 = arith.mulf %257, %261 : vector<2x32xf32>
    %cst_60 = arith.constant 0.000000e+00 : f32
    %263 = vector.broadcast %cst_60 : f32 to vector<2x32xf32>
    %264 = arith.cmpf ogt, %262, %263 : vector<2x32xf32>
    %cst_61 = arith.constant 0.000000e+00 : f32
    %265 = vector.broadcast %cst_61 : f32 to vector<2x32xf32>
    %266 = arith.minimumf %262, %265 : vector<2x32xf32>
    %267 = math.exp %266 : vector<2x32xf32>
    %cst_62 = arith.constant 1.000000e+00 : f32
    %268 = vector.broadcast %cst_62 : f32 to vector<2x32xf32>
    %269 = arith.subf %267, %268 : vector<2x32xf32>
    %270 = arith.select %264, %262, %269 : vector<2x32xi1>, vector<2x32xf32>
    %271 = vector.extract_strided_slice %16 {offsets = [14, 0], sizes = [2, 128], strides = [1, 1]} : vector<16x128xf32> to vector<2x128xf32>
    %cst_63 = arith.constant dense<0.000000e+00> : vector<2x128xf32>
    %272 = tpu.matmul %262, %12, %cst_63 {dimension_numbers = #tpu.dot_dimension_numbers<[1], [0], [0], [1], [0, 0, 1, 1], [], []>} : vector<2x32xf32>, vector<32x128xf32>, vector<2x128xf32> -> vector<2x128xf32>
    %273 = arith.addf %271, %272 : vector<2x128xf32>
    %274 = vector.extract_strided_slice %273 {offsets = [0, 0], sizes = [2, 32], strides = [1, 1]} : vector<2x128xf32> to vector<2x32xf32>
    %275 = arith.negf %274 : vector<2x32xf32>
    %276 = math.exp %275 : vector<2x32xf32>
    %cst_64 = arith.constant 1.000000e+00 : f32
    %277 = vector.broadcast %cst_64 : f32 to vector<2x32xf32>
    %278 = arith.addf %277, %276 : vector<2x32xf32>
    %279 = arith.divf %277, %278 : vector<2x32xf32>
    %280 = vector.extract_strided_slice %273 {offsets = [0, 32], sizes = [2, 32], strides = [1, 1]} : vector<2x128xf32> to vector<2x32xf32>
    %281 = arith.negf %280 : vector<2x32xf32>
    %282 = math.exp %281 : vector<2x32xf32>
    %cst_65 = arith.constant 1.000000e+00 : f32
    %283 = vector.broadcast %cst_65 : f32 to vector<2x32xf32>
    %284 = arith.addf %283, %282 : vector<2x32xf32>
    %285 = arith.divf %283, %284 : vector<2x32xf32>
    %286 = vector.extract_strided_slice %273 {offsets = [0, 64], sizes = [2, 32], strides = [1, 1]} : vector<2x128xf32> to vector<2x32xf32>
    %287 = math.tanh %286 : vector<2x32xf32>
    %288 = vector.extract_strided_slice %273 {offsets = [0, 96], sizes = [2, 32], strides = [1, 1]} : vector<2x128xf32> to vector<2x32xf32>
    %289 = arith.negf %288 : vector<2x32xf32>
    %290 = math.exp %289 : vector<2x32xf32>
    %cst_66 = arith.constant 1.000000e+00 : f32
    %291 = vector.broadcast %cst_66 : f32 to vector<2x32xf32>
    %292 = arith.addf %291, %290 : vector<2x32xf32>
    %293 = arith.divf %291, %292 : vector<2x32xf32>
    %294 = arith.mulf %285, %260 : vector<2x32xf32>
    %295 = arith.mulf %279, %287 : vector<2x32xf32>
    %296 = arith.addf %294, %295 : vector<2x32xf32>
    %297 = math.tanh %296 : vector<2x32xf32>
    %298 = arith.mulf %293, %297 : vector<2x32xf32>
    %cst_67 = arith.constant 0.000000e+00 : f32
    %299 = vector.broadcast %cst_67 : f32 to vector<2x32xf32>
    %300 = arith.cmpf ogt, %298, %299 : vector<2x32xf32>
    %cst_68 = arith.constant 0.000000e+00 : f32
    %301 = vector.broadcast %cst_68 : f32 to vector<2x32xf32>
    %302 = arith.minimumf %298, %301 : vector<2x32xf32>
    %303 = math.exp %302 : vector<2x32xf32>
    %cst_69 = arith.constant 1.000000e+00 : f32
    %304 = vector.broadcast %cst_69 : f32 to vector<2x32xf32>
    %305 = arith.subf %303, %304 : vector<2x32xf32>
    %306 = arith.select %300, %298, %305 : vector<2x32xi1>, vector<2x32xf32>
    %307 = tpu.concatenate %54, %90, %126, %162, %198, %234, %270, %306 in 1 : vector<2x32xf32>, vector<2x32xf32>, vector<2x32xf32>, vector<2x32xf32>, vector<2x32xf32>, vector<2x32xf32>, vector<2x32xf32>, vector<2x32xf32> -> vector<2x256xf32>
    %c0_70 = arith.constant 0 : index
    %c0_71 = arith.constant 0 : index
    %308 = vector.load %arg4[%c0_70, %c0_71] : memref<2x256xf32, #tpu.memory_space<vmem>>, vector<2x256xf32>
    tpu.vector_store %arg4[%c0_70, %c0_71], %307 {strides = array<i32>} : memref<2x256xf32, #tpu.memory_space<vmem>>, vector<2x256xf32>,
    return
  }
}

</mosaic_0001>

<bundles_post_ra>
// kernel: tpu_custom_call.1
= control target key start
LH: loop header
LB: loop body
LE: loop exit
PB: predicated region body
PF: predicated region fallthrough
CT: control target
= control target key end

     0   :  { %9 = vsyncpa [#allocation3], 0  ;;  %s1861_s0 = inlined_call_operand.hbm [shape: f32[16,40], index: 0, kind: input, shape index: {}]   ;;  %s1862_s1 = inlined_call_operand.vmem [shape: f32[40,32], index: 1, kind: input, shape index: {}]   ;;  %s1863_s2 = inlined_call_operand.vmem [shape: f32[65,128], index: 2, kind: input, shape index: {}]   ;;  %s1864_s3 = inlined_call_operand.vmem [shape: f32[4,32], index: 3, kind: input, shape index: {}]   ;;  %s1865_s4 = inlined_call_operand.hbm [shape: f32[2,256], index: 4, kind: output, shape index: {}]  }
   0x1   :  { %10 = vsyncpa [#allocation4], 0  ;;  %s1596_s15 = smov [#allocation2]   ;;  %s1548_s19 = scalar_lea.hbm %s1861_s0, 256 }
   0x2   :  { %s16_s16 = sshll.u32 %s1596_s15, 4  ;;  %p1549_p0 = scmp.ne.s32.totalorder %s1861_s0, %s1548_s19  ;;  %s17_s16 = int_to_ptr.vmem [resolvable:$true] %s16_s16 }
   0x3   :  { %p1552_p1 = scmp.lt.u32.totalorder %s1548_s19, %s1861_s0 }
   0x5   :  { %p1554_p2 = pnand %p1552_p1, %p1549_p0 }
   0x7   :  { %1557 = shalt.err (!%p1554_p2)
}
   0x8   :  { %s1558_s24 = scalar_lea.vmem %s17_s16, 256  ;;  %p1563_p4 = scmp.lt.s32.totalorder %s17_s16, %s17_s16 }
   0x9   :  { %p1559_p3 = scmp.ne.s32.totalorder %s17_s16, %s1558_s24  ;;  %p1564_p5 = scmp.lt.s32.totalorder %s1558_s24, %s1558_s24 }
   0xb   :  { %p1565_p6 = por %p1564_p5, %p1563_p4 }
   0xd   :  { %p1566_p7 = pnand %p1565_p6, %p1559_p3 }
   0xf   :  { %1569 = shalt.err (!%p1566_p7)
}
  0x10   :  { %s1597_s25 = smov 128   ;;  %s1598_s26 = smov 8  }
  0x11   :  { %22 = dma.hbm_to_vmem [thread:$0]  %s1861_s0, 256, %s17_s16, [#allocation3], %s1597_s25, %s1597_s25, %s1598_s26  }
  0x12   :  { %1592 = dma.done.wait [#allocation3], 256  }
  0x13   :  { %1593 = vsyncadd [#allocation3], 4294967040  ;;  %vm39_vm0 = vcmask 326656   ;;  %v34_v0 = vld [vmem:[%s1862_s1] sm:$0xff]  ;;  %v35_v1 = vld [vmem:[%s1862_s1 + $0x8] sm:$0xff]  ;;  %v1599_v18 = vmov 0.0|0.0  }
  0x14   :  { %v36_v2 = vld [vmem:[%s1862_s1 + $0x10] sm:$0xff]  ;;  %v1390_v3 = vpack.c.bf16 %v35_v1, %v34_v0  ;;  %v37_v4 = vld [vmem:[%s1862_s1 + $0x18] sm:$0xff]  ;;  %v32_v5 = vld [vmem:[#allocation2] sm:$0xff]  ;;  %vm1600_vm1 = vmmov 0   ;;  %v1601_v22 = vmov 0.0   ;;  %vm146_vm2 = vcmask 261120  }
  0x15   :  { %v1394_v6 = vpack.c.bf16 %v37_v4, %v36_v2  ;;  %1288 = vmatprep.mubr.msk.f32.mxu0 %vm39_vm0, %v32_v5  ;;  %v38_v7 = vld [vmem:[%s1862_s1 + $0x20] sm:$0xff]  ;;  %v33_v8 = vld [vmem:[#allocation2 + $0x8] sm:$0xff]  ;;  %v135_v12 = vld [vmem:[%s1863_s2 + $0x10] sm:$0xff]  ;;  %s1602_s5 = smov 64   ;;  %vm1159_vm12 = vcmask 523264   ;;  %vm1161_vm14 = vcmask 785408  }
  0x16   :  { %1391 = vmatprep.subr.bf16.mxu0 %v1390_v3  ;;  %v133_v9 = vld [vmem:[%s1863_s2] sm:$0xff]  ;;  %v134_v10 = vld [vmem:[%s1863_s2 + $0x8] sm:$0xff]  ;;  %v136_v13 = vld [vmem:[%s1863_s2 + $0x18] sm:$0xff]  ;;  %s1605_s8 = smov [#allocation5]  }
  0x17   :  { %1393 = vmatpush3.bf16.msra.mxu0 %v1390_v3  ;;  %v1398_v11 = vpack.c.bf16 %v134_v10, %v133_v9  ;;  %v1402_v14 = vpack.c.bf16 %v136_v13, %v135_v12  ;;  %v137_v15 = vld [vmem:[%s1863_s2 + $0x20] sm:$0xff]  ;;  %v138_v16 = vld [vmem:[%s1863_s2 + $0x28] sm:$0xff]  ;;  %v139_v19 = vld [vmem:[%s1863_s2 + $0x30] sm:$0xff]  ;;  %s1184_s9 = sshll.u32 %s1605_s8, 4  ;;  %s1185_s9 = int_to_ptr.vmem [resolvable:$true] %s1184_s9 }
  0x18   :  { %1395 = vmatprep.subr.bf16.mxu0 %v1394_v6  ;;  %v1678_v17 = vpack.c.bf16 %v138_v16, %v137_v15  ;;  %v140_v20 = vld [vmem:[%s1863_s2 + $0x38] sm:$0xff]  ;;  %v228_v35 = vld [vmem:[%s1864_s3] sm:$0x3]  ;;  %v229_v45 = vld [vmem:[%s1864_s3 + $0x2] sm:$0x3]  ;;  %s1604_s3 = smov 96   ;;  %p1575_p9 = scmp.lt.s32.totalorder %s1185_s9, %s1185_s9 }
  0x19   :  { %1399 = vmatprep.subr.bf16.mxu1 %v1398_v11  ;;  %v1690_v21 = vpack.c.bf16 %v140_v20, %v139_v19  ;;  %v1197_v36 = vld [vmem:[%s1863_s2 + $0x40] ss:$0 sm:$0xff]  ;;  %s1603_s2 = smov 32   ;;  %s1570_s10 = scalar_lea.vmem %s1185_s9, 64 }
  0x1a   :  { %1401 = vmatpush3.bf16.msra.mxu1 %v1398_v11  ;;  %p1571_p8 = scmp.ne.s32.totalorder %s1185_s9, %s1570_s10  ;;  %p1576_p10 = scmp.lt.s32.totalorder %s1570_s10, %s1570_s10 }
  0x1b   :  { %1397 = vmatpush3.bf16.msra.mxu0 %v1394_v6  ;;  %1403 = vmatprep.subr.bf16.mxu1 %v1402_v14 }
  0x1c   :  { %1286 = vmatprep.subr.mxu0 %v38_v7  ;;  %p1577_p11 = por %p1576_p10, %p1575_p9 }
  0x1e   :  { %1405 = vmatpush3.bf16.msra.mxu1 %v1402_v14  ;;  %p1578_p12 = pnand %p1577_p11, %p1571_p8 }
  0x1f   :  { %1287 = vmatpush3.msra.mxu0 %v38_v7  ;;  %1406 = vmatprep.subr.bf16.mxu1 %v1599_v18 }
  0x20   :  { %1289 = vmatmul.mubr.msk.f32.vlgmr.msra.gmra.mrb[0].mxu0 %vm39_vm0, %v33_v8  ;;  %1412 = vmatprep.subr.bf16.mxu0 %v1599_v18 }
  0x21   :  { %1414 = vmatpush3.bf16.msra.mxu0 %v1678_v17  ;;  %1321 = vmatprep.mubr.msk.f32.mxu0 %vm1600_vm1, %v1601_v22 }
  0x22   :  { %1415 = vmatprep.subr.bf16.mxu0 %v1599_v18 }
  0x25   :  { %1417 = vmatpush3.bf16.msra.mxu0 %v1690_v21 }
  0x26   :  { %1424 = vmatprep.subr.bf16.mxu0 %v1599_v18 }
  0xf3   :  { %v1290_v23 = vpop.f32.mrb[0].mxu0 }
  0xf4   :  { %v124_v24 = vmin.f32 %v1290_v23, 0.0  ;;  %v112_v25 = vpop.f32.mrb[1].mxu0  ;;  %vm122_vm4 = vcmp.gt.f32.partialorder %v1290_v23, 0.0 }
  0xf5   :  { %v123_v26 = vmin.f32 %v112_v25, 0.0  ;;  %vm121_vm3 = vcmp.gt.f32.partialorder %v112_v25, 0.0 }
  0xf6   :  { %v127_v27 = vmul.f32 1.442695, %v124_v24 }
  0xf7   :  { %v125_v28 = vmul.f32 1.442695, %v123_v26 }
  0xf8   :  { %1464 = vpow2.f32 %v127_v27 }
  0xf9   :  { %1466 = vpow2.f32 %v125_v28 }
 0x102   :  { %v1465_v29 = vpop.eup %1464 }
 0x103   :  { %v1467_v30 = vpop.eup %1466  ;;  %v1196_v31 = vadd.f32 -1.0, %v1465_v29 }
 0x104   :  { %v1195_v32 = vadd.f32 -1.0, %v1467_v30 }
 0x105   :  { %v132_v34 = vsel %vm122_vm4, %v1290_v23, %v1196_v31 }
 0x106   :  { %v131_v33 = vsel %vm121_vm3, %v112_v25, %v1195_v32 }
 0x107   :  { %1299 = vmatprep.mubr.msk.f32.mxu1 %vm146_vm2, %v131_v33 }
 0x108   :  { %1300 = vmatmul.mubr.msk.f32.vlgmr.msra.gmra.mrb[0].mxu1 %vm146_vm2, %v132_v34 }
 0x109   :  { %1408 = vmatpush3.bf16.msra.mxu1 %v1678_v17  ;;  %1310 = vmatprep.mubr.msk.f32.mxu1 %vm1600_vm1, %v1601_v22 }
 0x10a   :  { %1409 = vmatprep.subr.bf16.mxu1 %v1599_v18 }
 0x10d   :  { %1411 = vmatpush3.bf16.msra.mxu1 %v1690_v21 }
 0x10e   :  { %1418 = vmatprep.subr.bf16.mxu1 %v1599_v18 }
 0x110   :  { %1311 = vmatmul.mubr.msk.f32.vlgmr.msra.gmra.mrb[2].mxu1 %vm146_vm2, %v228_v35 }
 0x111   :  { %1420 = vmatpush3.bf16.msra.mxu1 %v1678_v17  ;;  %1332 = vmatprep.mubr.msk.f32.mxu1 %vm1600_vm1, %v1601_v22 }
 0x112   :  { %1421 = vmatprep.subr.bf16.mxu1 %v1599_v18 }
 0x115   :  { %1423 = vmatpush3.bf16.msra.mxu1 %v1690_v21 }
 0x116   :  { %1430 = vmatprep.subr.bf16.mxu1 %v1599_v18 }
 0x1db   :  { %v1301_v37 = vpop.f32.mrb[0].mxu1 }
 0x1dc   :  { %v1717_v38 = vadd.f32 %v1301_v37, %v1197_v36  ;;  %v219_v39 = vpop.f32.mrb[1].mxu1 }
 0x1dd   :  { %v1719_v40 = vadd.f32 %v1197_v36, %v219_v39 }
 0x1e3   :  { %v299_v41 = vpop.f32.mrb[2].mxu1 }
 0x1e4   :  { %v303_v42 = vadd.f32 %v299_v41, %v1719_v40  ;;  %v1312_v43 = vpop.f32.mrb[3].mxu1 }
 0x1e6   :  { %1468 = vtanh.f32 %v303_v42  ;;  %v1201_v46 = vmul.f32 -1.442695, %v303_v42 }
 0x1e8   :  { %1470 = vpow2.f32 %v1201_v46 }
 0x1f0   :  { %v1469_v44 = vpop.eup %1468 }
 0x1f1   :  { %317 = vrot.lane.b32.xlu0 %v1469_v44, %s1602_s5 }
 0x1f2   :  { %v1471_v47 = vpop.eup %1470 }
 0x1f3   :  { %v307_v48 = vadd.f32 1.0, %v1471_v47 }
 0x1f5   :  { %312 = vrot.lane.b32.xlu0 %v229_v45, %s1603_s2  ;;  %1472 = vrcp.f32 %v307_v48 }
 0x1ff   :  { %v1473_v49 = vpop.eup %1472 }
 0x263   :  { %v318_v50 = vpop.permute.xlu0 %317 }
 0x264   :  { %v320_v51 = vmul.f32 %v1473_v49, %v318_v50 }
 0x266   :  { %322 = vrot.lane.b32.xlu1 %v320_v51, %s1603_s2 }
 0x267   :  { %v313_v52 = vpop.permute.xlu0 %312 }
 0x268   :  { %v315_v53 = vmul.f32 %v1473_v49, %v313_v52 }
 0x2d8   :  { %v323_v54 = vpop.permute.xlu1 %322 }
 0x2d9   :  { %v325_v55 = vadd.f32 %v323_v54, %v315_v53 }
 0x2db   :  { %1474 = vtanh.f32 %v325_v55  ;;  %v425_v7 = vrot.slane %v325_v55, 6 }
 0x2e5   :  { %v1475_v56 = vpop.eup %1474 }
 0x2e6   :  { %328 = vrot.lane.b32.xlu1 %v1475_v56, %s1602_s5 }
 0x358   :  { %v329_v57 = vpop.permute.xlu1 %328 }
 0x359   :  { %v1729_v58 = vmul.f32 %v1473_v49, %v329_v57 }
 0x35b   :  { %339 = vrot.lane.b32.xlu0 %v1729_v58, %s1603_s2  ;;  %vm332_vm5 = vcmp.gt.f32.partialorder %v1729_v58, 0.0 }
 0x3cd   :  { %v340_v59 = vpop.permute.xlu0 %339 }
 0x3ce   :  { %1322 = vmatmul.mubr.msk.f32.vlgmr.msra.gmra.mrb[2].mxu0 %vm146_vm2, %v340_v59 }
 0x3cf   :  { %1426 = vmatpush3.bf16.msra.mxu0 %v1678_v17  ;;  %1343 = vmatprep.mubr.msk.f32.mxu0 %vm1600_vm1, %v1601_v22 }
 0x3d0   :  { %1427 = vmatprep.subr.bf16.mxu0 %v1599_v18 }
 0x3d3   :  { %1429 = vmatpush3.bf16.msra.mxu0 %v1690_v21 }
 0x3d4   :  { %1436 = vmatprep.subr.bf16.mxu0 %v1599_v18 }
 0x4a1   :  { %v409_v60 = vpop.f32.mrb[2].mxu0 }
 0x4a2   :  { %v414_v61 = vrot.slane %v409_v60, 6  ;;  %v1323_v62 = vpop.f32.mrb[3].mxu0 }
 0x4a4   :  { %v416_v63 = vadd.f32 %v414_v61, %v1719_v40 }
 0x4a6   :  { %1476 = vtanh.f32 %v416_v63  ;;  %v1204_v1 = vmul.f32 -1.442695, %v416_v63 }
 0x4a8   :  { %1478 = vpow2.f32 %v1204_v1 }
 0x4b0   :  { %v1477_v0 = vpop.eup %1476 }
 0x4b1   :  { %429 = vrot.lane.b32.xlu1 %v1477_v0, %s1602_s5 }
 0x4b2   :  { %v1479_v2 = vpop.eup %1478 }
 0x4b3   :  { %v420_v3 = vadd.f32 1.0, %v1479_v2 }
 0x4b5   :  { %1480 = vrcp.f32 %v420_v3 }
 0x4bf   :  { %v1481_v4 = vpop.eup %1480 }
 0x4c0   :  { %v427_v8 = vmul.f32 %v1481_v4, %v425_v7 }
 0x523   :  { %v430_v5 = vpop.permute.xlu1 %429 }
 0x524   :  { %v432_v6 = vmul.f32 %v1481_v4, %v430_v5 }
 0x526   :  { %434 = vrot.lane.b32.xlu0 %v432_v6, %s1603_s2 }
 0x598   :  { %v435_v9 = vpop.permute.xlu0 %434 }
 0x599   :  { %v437_v10 = vadd.f32 %v435_v9, %v427_v8 }
 0x59b   :  { %1482 = vtanh.f32 %v437_v10  ;;  %v538_v31 = vrot.slane %v437_v10, 6 }
 0x5a5   :  { %v1483_v11 = vpop.eup %1482 }
 0x5a6   :  { %440 = vrot.lane.b32.xlu1 %v1483_v11, %s1602_s5 }
 0x618   :  { %v441_v12 = vpop.permute.xlu1 %440 }
 0x619   :  { %v1744_v13 = vmul.f32 %v1481_v4, %v441_v12 }
 0x61b   :  { %v451_v14 = vrot.slane %v1744_v13, 2  ;;  %vm444_vm8 = vcmp.gt.f32.partialorder %v1744_v13, 0.0 }
 0x61d   :  { %452 = vrot.lane.b32.xlu0 %v451_v14, %s1603_s2 }
 0x68f   :  { %v453_v15 = vpop.permute.xlu0 %452 }
 0x690   :  { %1333 = vmatmul.mubr.msk.f32.vlgmr.msra.gmra.mrb[4].mxu1 %vm146_vm2, %v453_v15 }
 0x691   :  { %1432 = vmatpush3.bf16.msra.mxu1 %v1678_v17  ;;  %1354 = vmatprep.mubr.msk.f32.mxu1 %vm1600_vm1, %v1601_v22 }
 0x692   :  { %1433 = vmatprep.subr.bf16.mxu1 %v1599_v18 }
 0x695   :  { %1435 = vmatpush3.bf16.msra.mxu1 %v1690_v21 }
 0x696   :  { %1442 = vmatprep.subr.bf16.mxu1 %v1599_v18 }
 0x763   :  { %v522_v16 = vpop.f32.mrb[4].mxu1 }
 0x764   :  { %v527_v19 = vrot.slane %v522_v16, 4  ;;  %v1334_v20 = vpop.f32.mrb[5].mxu1 }
 0x766   :  { %v529_v23 = vadd.f32 %v527_v19, %v1719_v40 }
 0x768   :  { %1484 = vtanh.f32 %v529_v23  ;;  %v1207_v25 = vmul.f32 -1.442695, %v529_v23 }
 0x76a   :  { %1486 = vpow2.f32 %v1207_v25 }
 0x772   :  { %v1485_v24 = vpop.eup %1484 }
 0x773   :  { %542 = vrot.lane.b32.xlu1 %v1485_v24, %s1602_s5 }
 0x774   :  { %v1487_v26 = vpop.eup %1486 }
 0x775   :  { %v533_v27 = vadd.f32 1.0, %v1487_v26 }
 0x777   :  { %1488 = vrcp.f32 %v533_v27 }
 0x781   :  { %v1489_v28 = vpop.eup %1488 }
 0x782   :  { %v540_v32 = vmul.f32 %v1489_v28, %v538_v31 }
 0x7e5   :  { %v543_v29 = vpop.permute.xlu1 %542 }
 0x7e6   :  { %v545_v30 = vmul.f32 %v1489_v28, %v543_v29 }
 0x7e8   :  { %547 = vrot.lane.b32.xlu0 %v545_v30, %s1603_s2 }
 0x85a   :  { %v548_v33 = vpop.permute.xlu0 %547 }
 0x85b   :  { %v550_v34 = vadd.f32 %v548_v33, %v540_v32 }
 0x85d   :  { %1490 = vtanh.f32 %v550_v34  ;;  %v651_v53 = vrot.slane %v550_v34, 6 }
 0x867   :  { %v1491_v35 = vpop.eup %1490 }
 0x868   :  { %553 = vrot.lane.b32.xlu1 %v1491_v35, %s1602_s5 }
 0x8da   :  { %v554_v36 = vpop.permute.xlu1 %553 }
 0x8db   :  { %v1759_v37 = vmul.f32 %v1489_v28, %v554_v36 }
 0x8dd   :  { %v564_v39 = vrot.slane %v1759_v37, 4  ;;  %vm557_vm7 = vcmp.gt.f32.partialorder %v1759_v37, 0.0 }
 0x8df   :  { %565 = vrot.lane.b32.xlu0 %v564_v39, %s1603_s2 }
 0x951   :  { %v566_v41 = vpop.permute.xlu0 %565 }
 0x952   :  { %1344 = vmatmul.mubr.msk.f32.vlgmr.msra.gmra.mrb[4].mxu0 %vm146_vm2, %v566_v41 }
 0x953   :  { %1438 = vmatpush3.bf16.msra.mxu0 %v1678_v17  ;;  %1365 = vmatprep.mubr.msk.f32.mxu0 %vm1600_vm1, %v1601_v22 }
 0x954   :  { %1439 = vmatprep.subr.bf16.mxu0 %v1599_v18 }
 0x957   :  { %1441 = vmatpush3.bf16.msra.mxu0 %v1690_v21 }
 0x958   :  { %1448 = vmatprep.subr.bf16.mxu0 %v1599_v18 }
 0xa25   :  { %v635_v42 = vpop.f32.mrb[4].mxu0 }
 0xa26   :  { %v640_v43 = vrot.slane %v635_v42, 2  ;;  %v1345_v44 = vpop.f32.mrb[5].mxu0 }
 0xa28   :  { %v642_v45 = vadd.f32 %v640_v43, %v1719_v40 }
 0xa2a   :  { %1492 = vtanh.f32 %v642_v45  ;;  %v1210_v47 = vmul.f32 -1.442695, %v642_v45 }
 0xa2c   :  { %1494 = vpow2.f32 %v1210_v47 }
 0xa34   :  { %v1493_v46 = vpop.eup %1492 }
 0xa35   :  { %655 = vrot.lane.b32.xlu1 %v1493_v46, %s1602_s5 }
 0xa36   :  { %v1495_v48 = vpop.eup %1494 }
 0xa37   :  { %v646_v49 = vadd.f32 1.0, %v1495_v48 }
 0xa39   :  { %1496 = vrcp.f32 %v646_v49 }
 0xa43   :  { %v1497_v50 = vpop.eup %1496 }
 0xa44   :  { %v653_v54 = vmul.f32 %v1497_v50, %v651_v53 }
 0xaa7   :  { %v656_v51 = vpop.permute.xlu1 %655 }
 0xaa8   :  { %v658_v52 = vmul.f32 %v1497_v50, %v656_v51 }
 0xaaa   :  { %660 = vrot.lane.b32.xlu0 %v658_v52, %s1603_s2 }
 0xb1c   :  { %v661_v55 = vpop.permute.xlu0 %660 }
 0xb1d   :  { %v663_v56 = vadd.f32 %v661_v55, %v653_v54 }
 0xb1f   :  { %1498 = vtanh.f32 %v663_v56  ;;  %v761_v8 = vrot.slane %v663_v56, 6 }
 0xb29   :  { %v1499_v40 = vpop.eup %1498 }
 0xb2a   :  { %666 = vrot.lane.b32.xlu1 %v1499_v40, %s1602_s5 }
 0xb9c   :  { %v667_v57 = vpop.permute.xlu1 %666 }
 0xb9d   :  { %v1774_v59 = vmul.f32 %v1497_v50, %v667_v57 }
 0xb9f   :  { %v677_v60 = vrot.slane %v1774_v59, 6  ;;  %vm670_vm11 = vcmp.gt.f32.partialorder %v1774_v59, 0.0 }
 0xba1   :  { %678 = vrot.lane.b32.xlu0 %v677_v60, %s1603_s2 }
 0xc13   :  { %v679_v61 = vpop.permute.xlu0 %678 }
 0xc14   :  { %1355 = vmatmul.mubr.msk.f32.vlgmr.msra.gmra.mrb[6].mxu1 %vm146_vm2, %v679_v61 }
 0xc15   :  { %1444 = vmatpush3.bf16.msra.mxu1 %v1678_v17  ;;  %1376 = vmatprep.mubr.msk.f32.mxu1 %vm1600_vm1, %v1601_v22 }
 0xc16   :  { %1445 = vmatprep.subr.bf16.mxu1 %v1599_v18 }
 0xc19   :  { %1447 = vmatpush3.bf16.msra.mxu1 %v1690_v21 }
 0xce7   :  { %v748_v62 = vpop.f32.mrb[6].mxu1 }
 0xce8   :  { %v752_v63 = vadd.f32 %v748_v62, %v1717_v38  ;;  %v1356_v0 = vpop.f32.mrb[7].mxu1 }
 0xcea   :  { %1500 = vtanh.f32 %v752_v63  ;;  %v1213_v2 = vmul.f32 -1.442695, %v752_v63 }
 0xcec   :  { %1502 = vpow2.f32 %v1213_v2 }
 0xcf4   :  { %v1501_v1 = vpop.eup %1500 }
 0xcf5   :  { %765 = vrot.lane.b32.xlu1 %v1501_v1, %s1602_s5 }
 0xcf6   :  { %v1503_v3 = vpop.eup %1502 }
 0xcf7   :  { %v756_v4 = vadd.f32 1.0, %v1503_v3  ;;  %v333_v3 = vmin.f32 %v1729_v58, 0.0 }
 0xcf9   :  { %1504 = vrcp.f32 %v756_v4 }
 0xd03   :  { %v1505_v5 = vpop.eup %1504 }
 0xd04   :  { %v763_v9 = vmul.f32 %v1505_v5, %v761_v8 }
 0xd67   :  { %v766_v6 = vpop.permute.xlu1 %765 }
 0xd68   :  { %v768_v7 = vmul.f32 %v1505_v5, %v766_v6  ;;  %v334_v6 = vmul.f32 1.442695, %v333_v3 }
 0xd6a   :  { %770 = vrot.lane.b32.xlu0 %v768_v7, %s1603_s2 }
 0xddc   :  { %v771_v10 = vpop.permute.xlu0 %770 }
 0xddd   :  { %v773_v11 = vadd.f32 %v771_v10, %v763_v9 }
 0xddf   :  { %1506 = vtanh.f32 %v773_v11 }
 0xde9   :  { %v1507_v12 = vpop.eup %1506 }
 0xdea   :  { %776 = vrot.lane.b32.xlu1 %v1507_v12, %s1602_s5 }
 0xe5c   :  { %v777_v14 = vpop.permute.xlu1 %776 }
 0xe5d   :  { %v1788_v15 = vmul.f32 %v1505_v5, %v777_v14  ;;  %v558_v5 = vmin.f32 %v1759_v37, 0.0 }
 0xe5f   :  { %787 = vrot.lane.b32.xlu0 %v1788_v15, %s1603_s2  ;;  %v781_v7 = vmin.f32 %v1788_v15, 0.0  ;;  %v559_v9 = vmul.f32 1.442695, %v558_v5  ;;  %vm780_vm6 = vcmp.gt.f32.partialorder %v1788_v15, 0.0 }
 0xe61   :  { %v782_v10 = vmul.f32 1.442695, %v781_v7 }
 0xed1   :  { %v788_v16 = vpop.permute.xlu0 %787 }
 0xed2   :  { %1366 = vmatmul.mubr.msk.f32.vlgmr.msra.gmra.mrb[6].mxu0 %vm146_vm2, %v788_v16 }
 0xed3   :  { %1450 = vmatpush3.bf16.msra.mxu0 %v1678_v17  ;;  %1387 = vmatprep.mubr.msk.f32.mxu0 %vm1600_vm1, %v1601_v22 }
 0xed4   :  { %1451 = vmatprep.subr.bf16.mxu0 %v1599_v18  ;;  %v873_v18 = vrot.slane %v773_v11, 6 }
 0xed7   :  { %1453 = vmatpush3.bf16.msra.mxu0 %v1690_v21 }
 0xfa5   :  { %v857_v19 = vpop.f32.mrb[6].mxu0 }
 0xfa6   :  { %v862_v20 = vrot.slane %v857_v19, 6  ;;  %v1367_v23 = vpop.f32.mrb[7].mxu0 }
 0xfa8   :  { %v864_v24 = vadd.f32 %v862_v20, %v1717_v38 }
 0xfaa   :  { %1508 = vtanh.f32 %v864_v24  ;;  %v1216_v26 = vmul.f32 -1.442695, %v864_v24 }
 0xfac   :  { %1510 = vpow2.f32 %v1216_v26 }
 0xfb4   :  { %v1509_v25 = vpop.eup %1508 }
 0xfb5   :  { %877 = vrot.lane.b32.xlu1 %v1509_v25, %s1602_s5 }
 0xfb6   :  { %v1511_v27 = vpop.eup %1510 }
 0xfb7   :  { %v868_v17 = vadd.f32 1.0, %v1511_v27 }
 0xfb9   :  { %1512 = vrcp.f32 %v868_v17 }
 0xfc3   :  { %v1513_v28 = vpop.eup %1512 }
 0xfc4   :  { %v875_v21 = vmul.f32 %v1513_v28, %v873_v18 }
0x1027   :  { %v878_v22 = vpop.permute.xlu1 %877 }
0x1028   :  { %v880_v29 = vmul.f32 %v1513_v28, %v878_v22 }
0x102a   :  { %882 = vrot.lane.b32.xlu0 %v880_v29, %s1603_s2 }
0x109c   :  { %v883_v30 = vpop.permute.xlu0 %882 }
0x109d   :  { %v885_v31 = vadd.f32 %v883_v30, %v875_v21 }
0x109f   :  { %1514 = vtanh.f32 %v885_v31  ;;  %v986_v51 = vrot.slane %v885_v31, 6 }
0x10a9   :  { %v1515_v32 = vpop.eup %1514 }
0x10aa   :  { %888 = vrot.lane.b32.xlu1 %v1515_v32, %s1602_s5 }
0x111c   :  { %v889_v33 = vpop.permute.xlu1 %888 }
0x111d   :  { %v1802_v34 = vmul.f32 %v1513_v28, %v889_v33 }
0x111f   :  { %v899_v35 = vrot.slane %v1802_v34, 2  ;;  %v893_v22 = vmin.f32 %v1802_v34, 0.0  ;;  %vm892_vm9 = vcmp.gt.f32.partialorder %v1802_v34, 0.0 }
0x1121   :  { %900 = vrot.lane.b32.xlu0 %v899_v35, %s1603_s2  ;;  %v894_v29 = vmul.f32 1.442695, %v893_v22 }
0x1193   :  { %v901_v36 = vpop.permute.xlu0 %900 }
0x1194   :  { %1377 = vmatmul.mubr.msk.f32.vlgmr.msra.gmra.mrb[8].mxu1 %vm146_vm2, %v901_v36 }
0x1267   :  { %v970_v39 = vpop.f32.mrb[8].mxu1 }
0x1268   :  { %v975_v41 = vrot.slane %v970_v39, 4  ;;  %v1378_v42 = vpop.f32.mrb[9].mxu1 }
0x126a   :  { %v977_v43 = vadd.f32 %v975_v41, %v1717_v38 }
0x126c   :  { %1516 = vtanh.f32 %v977_v43  ;;  %v1219_v45 = vmul.f32 -1.442695, %v977_v43 }
0x126e   :  { %1518 = vpow2.f32 %v1219_v45 }
0x1276   :  { %v1517_v44 = vpop.eup %1516 }
0x1277   :  { %990 = vrot.lane.b32.xlu1 %v1517_v44, %s1602_s5 }
0x1278   :  { %v1519_v46 = vpop.eup %1518 }
0x1279   :  { %v981_v47 = vadd.f32 1.0, %v1519_v46 }
0x127b   :  { %1520 = vrcp.f32 %v981_v47 }
0x1285   :  { %v1521_v48 = vpop.eup %1520 }
0x1286   :  { %v988_v52 = vmul.f32 %v1521_v48, %v986_v51 }
0x12e9   :  { %v991_v49 = vpop.permute.xlu1 %990 }
0x12ea   :  { %v993_v50 = vmul.f32 %v1521_v48, %v991_v49 }
0x12ec   :  { %995 = vrot.lane.b32.xlu0 %v993_v50, %s1603_s2 }
0x135e   :  { %v996_v53 = vpop.permute.xlu0 %995 }
0x135f   :  { %v998_v54 = vadd.f32 %v996_v53, %v988_v52 }
0x1361   :  { %1522 = vtanh.f32 %v998_v54  ;;  %v1099_v21 = vrot.slane %v998_v54, 6 }
0x136b   :  { %v1523_v55 = vpop.eup %1522 }
0x136c   :  { %1001 = vrot.lane.b32.xlu1 %v1523_v55, %s1602_s5 }
0x13de   :  { %v1002_v56 = vpop.permute.xlu1 %1001 }
0x13df   :  { %v1811_v40 = vmul.f32 %v1521_v48, %v1002_v56  ;;  %v671_v48 = vmin.f32 %v1774_v59, 0.0 }
0x13e1   :  { %v1012_v57 = vrot.slane %v1811_v40, 4  ;;  %v1006_v18 = vmin.f32 %v1811_v40, 0.0  ;;  %vm1005_vm10 = vcmp.gt.f32.partialorder %v1811_v40, 0.0  ;;  %v672_v49 = vmul.f32 1.442695, %v671_v48 }
0x13e3   :  { %1013 = vrot.lane.b32.xlu0 %v1012_v57, %s1603_s2 }
0x1455   :  { %v1014_v60 = vpop.permute.xlu0 %1013 }
0x1456   :  { %1388 = vmatmul.mubr.msk.f32.vlgmr.msra.gmra.mrb[8].mxu0 %vm146_vm2, %v1014_v60 }
0x1529   :  { %v1083_v61 = vpop.f32.mrb[8].mxu0 }
0x152a   :  { %v1088_v62 = vrot.slane %v1083_v61, 2  ;;  %v1389_v63 = vpop.f32.mrb[9].mxu0 }
0x152c   :  { %v1090_v0 = vadd.f32 %v1088_v62, %v1717_v38 }
0x152e   :  { %1524 = vtanh.f32 %v1090_v0  ;;  %v1222_v2 = vmul.f32 -1.442695, %v1090_v0 }
0x1530   :  { %1526 = vpow2.f32 %v1222_v2 }
0x1531   :  { %1528 = vpow2.f32 %v334_v6 }
0x1538   :  { %v1525_v1 = vpop.eup %1524 }
0x1539   :  { %1103 = vrot.lane.b32.xlu1 %v1525_v1, %s1602_s5 }
0x153a   :  { %v1527_v4 = vpop.eup %1526 }
0x153b   :  { %v1094_v8 = vadd.f32 1.0, %v1527_v4  ;;  %v1529_v38 = vpop.eup %1528 }
0x153c   :  { %v1202_v19 = vadd.f32 -1.0, %v1529_v38 }
0x153d   :  { %1530 = vrcp.f32 %v1094_v8 }
0x153e   :  { %1532 = vpow2.f32 %v559_v9  ;;  %v337_v23 = vsel %vm332_vm5, %v1729_v58, %v1202_v19  ;;  %v445_v58 = vmin.f32 %v1744_v13, 0.0 }
0x153f   :  { %1534 = vpow2.f32 %v782_v10 }
0x1540   :  { %v446_v28 = vmul.f32 1.442695, %v445_v58 }
0x1542   :  { %1536 = vpow2.f32 %v446_v28 }
0x1543   :  { %1538 = vpow2.f32 %v894_v29 }
0x1547   :  { %v1531_v11 = vpop.eup %1530 }
0x1548   :  { %v1533_v16 = vpop.eup %1532  ;;  %v1101_v30 = vmul.f32 %v1531_v11, %v1099_v21 }
0x1549   :  { %v1535_v20 = vpop.eup %1534  ;;  %v1208_v25 = vadd.f32 -1.0, %v1533_v16 }
0x154a   :  { %v1214_v24 = vadd.f32 -1.0, %v1535_v20 }
0x154b   :  { %v562_v27 = vsel %vm557_vm7, %v1759_v37, %v1208_v25 }
0x154c   :  { %v785_v26 = vsel %vm780_vm6, %v1788_v15, %v1214_v24  ;;  %v1134_v17 = vrot.slane %v562_v27, 4  ;;  %v1007_v15 = vmul.f32 1.442695, %v1006_v18  ;;  %v1537_v32 = vpop.eup %1536 }
0x154d   :  { %v1205_v33 = vadd.f32 -1.0, %v1537_v32  ;;  %v1539_v35 = vpop.eup %1538 }
0x154e   :  { %v1217_v41 = vadd.f32 -1.0, %v1539_v35 }
0x154f   :  { %v449_v39 = vsel %vm444_vm8, %v1744_v13, %v1205_v33 }
0x1550   :  { %v1129_v43 = vrot.slane %v449_v39, 2  ;;  %v897_v44 = vsel %vm892_vm9, %v1802_v34, %v1217_v41 }
0x1551   :  { %v1146_v46 = vrot.slane %v897_v44, 2 }
0x15ab   :  { %v1104_v12 = vpop.permute.xlu1 %1103 }
0x15ac   :  { %v1106_v14 = vmul.f32 %v1531_v11, %v1104_v12 }
0x15ae   :  { %1108 = vrot.lane.b32.xlu0 %v1106_v14, %s1603_s2 }
0x15b2   :  { %1125 = vrot.lane.b32.xlu0 %v337_v23, %s1603_s2 }
0x15b6   :  { %1142 = vrot.lane.b32.xlu0 %v785_v26, %s1603_s2 }
0x15ba   :  { %1135 = vrot.lane.b32.xlu0 %v1134_v17, %s1604_s3 }
0x1620   :  { %v1109_v37 = vpop.permute.xlu0 %1108 }
0x1621   :  { %v1111_v31 = vadd.f32 %v1109_v37, %v1101_v30 }
0x1623   :  { %1540 = vtanh.f32 %v1111_v31 }
0x1624   :  { %1542 = vpow2.f32 %v1007_v15  ;;  %v1126_v53 = vpop.permute.xlu0 %1125 }
0x1625   :  { %1544 = vpow2.f32 %v672_v49 }
0x1628   :  { %v1143_v56 = vpop.permute.xlu0 %1142 }
0x162c   :  { %v1136_v0 = vpop.permute.xlu0 %1135 }
0x162d   :  { %v1541_v36 = vpop.eup %1540 }
0x162e   :  { %v1543_v42 = vpop.eup %1542  ;;  %1114 = vrot.lane.b32.xlu1 %v1541_v36, %s1602_s5 }
0x162f   :  { %v1220_v45 = vadd.f32 -1.0, %v1543_v42  ;;  %v1545_v55 = vpop.eup %1544 }
0x1631   :  { %v1010_v47 = vsel %vm1005_vm10, %v1811_v40, %v1220_v45  ;;  %v1211_v40 = vadd.f32 -1.0, %v1545_v55 }
0x1632   :  { %1130 = vrot.lane.b32.xlu1 %v1129_v43, %s1602_s5  ;;  %v1151_v13 = vrot.slane %v1010_v47, 4 }
0x1633   :  { %v675_v62 = vsel %vm670_vm11, %v1774_v59, %v1211_v40 }
0x1634   :  { %v1139_v4 = vrot.slane %v675_v62, 6 }
0x1636   :  { %1147 = vrot.lane.b32.xlu1 %v1146_v46, %s1602_s5 }
0x163a   :  { %1152 = vrot.lane.b32.xlu1 %v1151_v13, %s1604_s3 }
0x16a0   :  { %v1115_v50 = vpop.permute.xlu1 %1114 }
0x16a1   :  { %v1117_v51 = vmul.f32 %v1531_v11, %v1115_v50 }
0x16a3   :  { %v1119_v34 = vmin.f32 %v1117_v51, 0.0  ;;  %vm1118_vm13 = vcmp.gt.f32.partialorder %v1117_v51, 0.0 }
0x16a4   :  { %v1131_v54 = vpop.permute.xlu1 %1130 }
0x16a5   :  { %v1120_v52 = vmul.f32 1.442695, %v1119_v34  ;;  %v1158_v61 = vsel %vm146_vm2, %v1126_v53, %v1131_v54 }
0x16a6   :  { %v1160_v3 = vsel %vm1159_vm12, %v1158_v61, %v1136_v0 }
0x16a7   :  { %1546 = vpow2.f32 %v1120_v52  ;;  %v1162_v9 = vsel %vm1161_vm14, %v1160_v3, %v1139_v4 }
0x16a8   :  { %v1148_v57 = vpop.permute.xlu1 %1147 }
0x16a9   :  { %v1163_v6 = vsel %vm146_vm2, %v1143_v56, %v1148_v57 }
0x16ac   :  { %v1153_v1 = vpop.permute.xlu1 %1152 }
0x16ad   :  { %v1164_v7 = vsel %vm1159_vm12, %v1163_v6, %v1153_v1 }
0x16b1   :  { %v1547_v60 = vpop.eup %1546 }
0x16b2   :  { %v1223_v63 = vadd.f32 -1.0, %v1547_v60 }
0x16b4   :  { %v1123_v2 = vsel %vm1118_vm13, %v1117_v51, %v1223_v63 }
0x16b5   :  { %v1156_v5 = vrot.slane %v1123_v2, 6 }
0x16b7   :  { %v1165_v8 = vsel %vm1161_vm14, %v1164_v7, %v1156_v5 }
0x16b8   :  { %v1168_v10 = vcombine.low %v1162_v9, %v1165_v8 }
0x16ba   :  { %1224 = vst.sshfl [vmem:[#allocation5] sm:$0x33 pattern:$0x76325410] %v1168_v10 }
0x16bb   :  { %1581 = shalt.err (!%p1578_p12)
}
0x16bc   :  { %s1582_s12 = scalar_lea.hbm %s1865_s4, 64 }
0x16bd   :  { %p1583_p13 = scmp.ne.s32.totalorder %s1865_s4, %s1582_s12  ;;  %p1586_p0 = scmp.lt.u32.totalorder %s1582_s12, %s1865_s4 }
0x16bf   :  { %p1588_p1 = pnand %p1586_p0, %p1583_p13 }
0x16c1   :  { %1591 = shalt.err (!%p1588_p1)
}
0x16c2   :  { %1187 = dma.vmem_to_hbm [thread:$0]  %s1185_s9, 64, %s1865_s4, [#allocation4]  }
0x16c3   :  { %1594 = dma.done.wait [#allocation4], 64  }
0x16c4   :  { %1595 = vsyncadd [#allocation4], 4294967232 }
0x16c5   :  { %1191 = vsyncpa [#allocation3], 1 }
0x16c6   :  { %1192 = vsyncpa [#allocation4], 1 }

</bundles_post_ra>
